<compile_context>
chip_gen: v5e
topology: v5e:2x2
jax: 0.10.0
libtpu: 0.0.40
codegen_flags: <defaults>
</compile_context>

<pallas_src>
import math

import jax
import jax.numpy as jnp
from jax.experimental import pallas as pl
from jax.experimental.pallas import tpu as pltpu


def _round_up(x, m):
    return ((x + m - 1) // m) * m


def _l2_normalize(x, eps=1e-12):
    # F.normalize(p=2, dim=1): x / max(||x||_2, eps) == x * rsqrt(max(s, eps^2))
    s = jnp.sum(x * x, axis=1, keepdims=True)
    return x * jax.lax.rsqrt(jnp.maximum(s, eps * eps))


def make_arcface_kernel(*, scale, cos_m, sin_m, th, mm, num_classes,
                        tile_b, tile_c, n_b, n_c, exp_dtype):
    """Builds the per-(class-tile, batch-tile) kernel body."""
    del n_b  # grid extent only; not needed inside the body
    neg_big = -1e30          # finite "-inf": exp underflows to 0.0, never NaN
    has_pad = (n_c * tile_c) != num_classes

    def kernel(labels_ref, emb_ref, w_ref, raw_ref, loss_ref,
               m_scr, l_scr, tgt_scr):
        c = pl.program_id(0)                     # class tile (outer, reduction)
        b = pl.program_id(1)                     # batch tile (inner)
        row0 = pl.multiple_of(b * tile_b, tile_b)
        rows = pl.ds(row0, tile_b)               # this batch tile's scratch rows

        # --- init online-logsumexp state at the first class tile ------------
        @pl.when(c == 0)
        def _init():
            m_scr[rows, :] = jnp.full((tile_b, 1), neg_big, jnp.float32)
            l_scr[rows, :] = jnp.zeros((tile_b, 1), jnp.float32)
            tgt_scr[rows, :] = jnp.zeros((tile_b, 1), jnp.float32)

        # --- cosine = emb_n @ w_n^T for this (TB, TC) tile (MXU, f32 acc) ---
        cosine = jax.lax.dot_general(
            emb_ref[...], w_ref[...],
            dimension_numbers=(((1,), (1,)), ((), ())),   # trans-B, MXU-native
            preferred_element_type=jnp.float32)           # (TB, TC)

        labels = labels_ref[...]                          # (TB, 1) int32
        c_start = c * tile_c
        col_ids = c_start + jax.lax.broadcasted_iota(
            jnp.int32, cosine.shape, 1)                   # (TB, TC)
        onehot = col_ids == labels                        # (TB, TC) bool

        # --- ArcFace margin on the per-row target cosine only ---------------
        # Target cosine of each row *if* its label falls in this class tile
        # (0.0 otherwise; masked out below, so no NaN risk).
        t = jnp.sum(jnp.where(onehot, cosine, 0.0),
                    axis=1, keepdims=True)                # (TB, 1)
        sin_t = jnp.sqrt(jnp.maximum(1.0 - t * t, 0.0))
        t_margin = jnp.where(t > th, t * cos_m - sin_t * sin_m, t - mm)
        delta_scaled = (t_margin - t) * scale             # (TB, 1)

        # Fused chain: scale + margin correction (one select + add), stored
        # once (lane-dense) and reused for the LSE -> one live (TB,TC) temp.
        logits = cosine * scale + jnp.where(onehot, delta_scaled, 0.0)
        raw_ref[...] = logits.astype(raw_ref.dtype)

        # --- online logsumexp over the class axis ----------------------------
        def accumulate(x):
            m_old = m_scr[rows, :]
            m_new = jnp.maximum(m_old, jnp.max(x, axis=1, keepdims=True))
            alpha = jnp.exp(m_old - m_new)
            p = jnp.exp((x - m_new).astype(exp_dtype))    # bf16 exp opt on v6e/v7x
            l_scr[rows, :] = alpha * l_scr[rows, :] + jnp.sum(
                p.astype(jnp.float32), axis=1, keepdims=True)
            m_scr[rows, :] = m_new

        if has_pad:
            # Padded classes only exist in the very last class tile; gate the
            # full-tile mask there instead of paying for it on every tile.
            @pl.when(c == n_c - 1)
            def _last_tile():
                accumulate(jnp.where(col_ids < num_classes, logits, neg_big))

            @pl.when(c != n_c - 1)
            def _inner_tile():
                accumulate(logits)
        else:
            accumulate(logits)

        # --- accumulate the (scaled, margin-adjusted) target logit -----------
        in_tile = jnp.logical_and(labels >= c_start, labels < c_start + tile_c)
        tgt_scr[rows, :] = tgt_scr[rows, :] + jnp.where(
            in_tile, t_margin * scale, 0.0)

        # --- finalize per-row CE loss at the last class tile ------------------
        @pl.when(c == n_c - 1)
        def _finalize():
            loss_ref[...] = (m_scr[rows, :] + jnp.log(l_scr[rows, :])
                             - tgt_scr[rows, :])

    return kernel


def arcface_loss_forward(embeddings, labels, weight, *, scale, margin,
                         block_b=256, block_c=2048,
                         matmul_dtype=jnp.bfloat16,
                         raw_dtype=jnp.float32,
                         exp_dtype=jnp.float32,
                         vmem_limit_bytes=48 * 1024 * 1024,
                         dimension_semantics=("arbitrary", "arbitrary")):
    """Returns (raw_logits, loss) matching ArcFaceLoss.forward semantics.

    Tiling guidance:
      * block_b: multiple of 128 (>=256) for production batches; block_c in the
        1024-4096 range on v7x (64 MiB VMEM/TC, keep vmem_limit_bytes <= ~48MiB)
        and 4096-8192 on v5e/v6e (128 MiB VMEM; vmem_limit_bytes up to ~96MiB).
        Tiles are clamped to the padded problem so toy shapes don't over-pad.
      * The weight stays in its native (C, E) layout; choose block_c dividing C
        to avoid even the small jnp.pad copy.
      * v5e: consider raw_dtype=jnp.bfloat16 (halves the dominant raw-logit
        writeback and vector-store pressure).  v6e/v7x: exp_dtype=jnp.bfloat16
        roughly doubles EUP throughput for the full-tile exp.
      * v7x: to use both TensorCores pass dimension_semantics=("arbitrary",
        "parallel") (batch tiles split across cores); the kernel is typically
        HBM-bound, so the default sequential schedule is usually close.
      * matmul_dtype=jnp.float32 if exact parity with an f32 matmul is needed.
    """
    B, E = embeddings.shape
    C, E2 = weight.shape
    assert E == E2
    assert block_b % 8 == 0 and block_c % 128 == 0

    cos_m = math.cos(margin)
    sin_m = math.sin(margin)
    th = math.cos(math.pi - margin)
    mm = math.sin(math.pi - margin) * margin

    TB = min(block_b, _round_up(B, 8))
    TC = min(block_c, _round_up(C, 128))
    B_pad = _round_up(B, TB)
    C_pad = _round_up(C, TC)
    n_b = B_pad // TB
    n_c = C_pad // TC

    # Normalization hoisted out of the kernel (rsqrt).  No transpose copy of
    # the weight; pad only when needed (no-op when C % TC == 0 / B % TB == 0).
    emb_n = _l2_normalize(embeddings.astype(jnp.float32)).astype(matmul_dtype)
    w_n = _l2_normalize(weight.astype(jnp.float32)).astype(matmul_dtype)
    labels_i = labels.astype(jnp.int32).reshape(B, 1)
    if B_pad != B:
        emb_n = jnp.pad(emb_n, ((0, B_pad - B), (0, 0)))
        labels_i = jnp.pad(labels_i, ((0, B_pad - B), (0, 0)))
    if C_pad != C:
        w_n = jnp.pad(w_n, ((0, C_pad - C), (0, 0)))

    kernel = make_arcface_kernel(
        scale=scale, cos_m=cos_m, sin_m=sin_m, th=th, mm=mm, num_classes=C,
        tile_b=TB, tile_c=TC, n_b=n_b, n_c=n_c, exp_dtype=exp_dtype)

    raw_p, loss_rows = pl.pallas_call(
        kernel,
        grid=(n_c, n_b),                  # class tiles OUTER, batch tiles INNER
        out_shape=(
            jax.ShapeDtypeStruct((B_pad, C_pad), raw_dtype),   # raw logits
            jax.ShapeDtypeStruct((B_pad, 1), jnp.float32),     # per-row loss
        ),
        in_specs=[
            pl.BlockSpec((TB, 1), lambda c, b: (b, 0)),    # labels
            pl.BlockSpec((TB, E), lambda c, b: (b, 0)),    # normalized emb
            # Block index constant over the inner (batch) axis: each (TC, E)
            # weight tile is fetched from HBM exactly once for the whole grid.
            pl.BlockSpec((TC, E), lambda c, b: (c, 0)),    # normalized weight
        ],
        out_specs=(
            pl.BlockSpec((TB, TC), lambda c, b: (b, c)),   # raw logits tile
            pl.BlockSpec((TB, 1), lambda c, b: (b, 0)),    # per-row loss
        ),
        scratch_shapes=[
            pltpu.VMEM((B_pad, 1), jnp.float32),   # running max  m
            pltpu.VMEM((B_pad, 1), jnp.float32),   # running sum  l
            pltpu.VMEM((B_pad, 1), jnp.float32),   # target-logit accumulator
        ],
        compiler_params=pltpu.CompilerParams(
            dimension_semantics=dimension_semantics,
            vmem_limit_bytes=vmem_limit_bytes,
        ),
    )(labels_i, emb_n, w_n)

    raw_logits = raw_p[:B, :C]
    # Padded batch rows produce garbage loss_rows; they are sliced away here,
    # so the tiny O(B) mean stays in XLA (do NOT mean inside the kernel).
    loss = jnp.mean(loss_rows[:B, 0])
    return raw_logits, loss


if __name__ == "__main__":
    # Small config consistent with the module; large enough to exercise both
    # grid axes and the padded-class path with explicit small tiles.
    NUM_CLASSES = 200
    EMBEDDING_SIZE = 32
    MARGIN = 0.5
    SCALE = 30.0
    BATCH = 32

    key = jax.random.PRNGKey(0)
    k_emb, k_lbl, k_w = jax.random.split(key, 3)

    embeddings = jax.random.normal(k_emb, (BATCH, EMBEDDING_SIZE),
                                   dtype=jnp.float32)
    labels = jax.random.randint(k_lbl, (BATCH,), 0, NUM_CLASSES,
                                dtype=jnp.int32)
    # Deterministic xavier_uniform_-style init for weight (C, E).
    bound = math.sqrt(6.0 / (NUM_CLASSES + EMBEDDING_SIZE))
    weight = jax.random.uniform(k_w, (NUM_CLASSES, EMBEDDING_SIZE),
                                minval=-bound, maxval=bound,
                                dtype=jnp.float32)

    # Pure-JAX reference.  Matmul operands are bf16-quantized (matching the
    # kernel's MXU inputs) with f32 accumulation; margin/CE math in f32.
    emb_n = _l2_normalize(embeddings)
    w_n = _l2_normalize(weight)
    emb_q = emb_n.astype(jnp.bfloat16).astype(jnp.float32)
    w_q = w_n.astype(jnp.bfloat16).astype(jnp.float32)
    cosine = emb_q @ w_q.T
    idx = jnp.arange(BATCH)
    t = cosine[idx, labels]
    sin_t = jnp.sqrt(jnp.maximum(1.0 - t * t, 0.0))
    cos_pm = t * math.cos(MARGIN) - sin_t * math.sin(MARGIN)
    new_t = jnp.where(t > math.cos(math.pi - MARGIN), cos_pm,
                      t - math.sin(math.pi - MARGIN) * MARGIN)
    cosine_adj = cosine.at[idx, labels].set(new_t)
    raw_expected = cosine_adj * SCALE
    lse = jax.scipy.special.logsumexp(raw_expected, axis=1)
    loss_expected = jnp.mean(lse - raw_expected[idx, labels])

    # 1) Small explicit tiles: grid = (2 class tiles, 2 batch tiles), padded
    #    class axis -> exercises the online LSE, scratch indexing and the
    #    gated last-tile masking.
    raw_logits, loss = arcface_loss_forward(
        embeddings, labels, weight, scale=SCALE, margin=MARGIN,
        block_b=16, block_c=128)
    jax.block_until_ready((raw_logits, loss))
    assert raw_logits.shape == (BATCH, NUM_CLASSES)
    assert jnp.allclose(raw_logits, raw_expected, atol=5e-3, rtol=5e-3), (
        float(jnp.max(jnp.abs(raw_logits - raw_expected))))
    assert jnp.allclose(loss, loss_expected, atol=5e-3, rtol=5e-3), (
        float(loss), float(loss_expected))

    # 2) Production defaults (clamped to the toy problem -> single tile path).
    raw_logits2, loss2 = arcface_loss_forward(
        embeddings, labels, weight, scale=SCALE, margin=MARGIN)
    jax.block_until_ready((raw_logits2, loss2))
    assert jnp.allclose(raw_logits2, raw_expected, atol=5e-3, rtol=5e-3), (
        float(jnp.max(jnp.abs(raw_logits2 - raw_expected))))
    assert jnp.allclose(loss2, loss_expected, atol=5e-3, rtol=5e-3), (
        float(loss2), float(loss_expected))

    print("KERNEL_OK")
</pallas_src>

<mosaic_0001>
module attributes {stable_mosaic.version = 11 : i64} {
  func.func @kernel(%arg0: i32, %arg1: i32, %arg2: memref<16x1xi32, #tpu.memory_space<vmem>>, %arg3: memref<16x32xbf16, #tpu.memory_space<vmem>>, %arg4: memref<128x32xbf16, #tpu.memory_space<vmem>>, %arg5: memref<16x128xf32, #tpu.memory_space<vmem>>, %arg6: memref<16x1xf32, #tpu.memory_space<vmem>>, %arg7: memref<32x1xf32, #tpu.memory_space<vmem>>, %arg8: memref<32x1xf32, #tpu.memory_space<vmem>>, %arg9: memref<32x1xf32, #tpu.memory_space<vmem>>) attributes {dimension_semantics = [#tpu.dimension_semantics<arbitrary>, #tpu.dimension_semantics<arbitrary>], iteration_bounds = array<i64: 2, 2>, scalar_prefetch = 0 : i64, scratch_operands = 3 : i64, tpu.core_type = #tpu.core_type<tc>, window_params = [{transform_indices = @transform_0, window_bounds = array<i64: 16, 1>}, {transform_indices = @transform_1, window_bounds = array<i64: 16, 32>}, {transform_indices = @transform_2, window_bounds = array<i64: 128, 32>}, {transform_indices = @transform_3, window_bounds = array<i64: 16, 128>}, {transform_indices = @transform_4, window_bounds = array<i64: 16, 1>}]} {
    %c16_i32 = arith.constant 16 : i32
    %0 = arith.muli %arg1, %c16_i32 : i32
    %1 = tpu.assume_multiple %0, 16 : i32
    %c0_i32 = arith.constant 0 : i32
    %2 = arith.cmpi eq, %arg0, %c0_i32 : i32
    %3 = arith.extui %2 : i1 to i32
    %c0_i32_0 = arith.constant 0 : i32
    %4 = arith.cmpi ne, %3, %c0_i32_0 : i32
    scf.if %4 {
      %cst_29 = arith.constant -1.000000e+30 : f32
      %70 = vector.broadcast %cst_29 : f32 to vector<16x1xf32>
      %71 = arith.index_cast %1 : i32 to index
      %c0_30 = arith.constant 0 : index
      %72 = vector.load %arg7[%71, %c0_30] : memref<32x1xf32, #tpu.memory_space<vmem>>, vector<16x1xf32>
      tpu.vector_store %arg7[%71, %c0_30], %70 {strides = array<i32>} : memref<32x1xf32, #tpu.memory_space<vmem>>, vector<16x1xf32>,
      %cst_31 = arith.constant 0.000000e+00 : f32
      %73 = vector.broadcast %cst_31 : f32 to vector<16x1xf32>
      %74 = arith.index_cast %1 : i32 to index
      %c0_32 = arith.constant 0 : index
      %75 = vector.load %arg8[%74, %c0_32] : memref<32x1xf32, #tpu.memory_space<vmem>>, vector<16x1xf32>
      tpu.vector_store %arg8[%74, %c0_32], %73 {strides = array<i32>} : memref<32x1xf32, #tpu.memory_space<vmem>>, vector<16x1xf32>,
      %cst_33 = arith.constant 0.000000e+00 : f32
      %76 = vector.broadcast %cst_33 : f32 to vector<16x1xf32>
      %77 = arith.index_cast %1 : i32 to index
      %c0_34 = arith.constant 0 : index
      %78 = vector.load %arg9[%77, %c0_34] : memref<32x1xf32, #tpu.memory_space<vmem>>, vector<16x1xf32>
      tpu.vector_store %arg9[%77, %c0_34], %76 {strides = array<i32>} : memref<32x1xf32, #tpu.memory_space<vmem>>, vector<16x1xf32>,
    } else {
    }
    %c0 = arith.constant 0 : index
    %c0_1 = arith.constant 0 : index
    %5 = vector.load %arg3[%c0, %c0_1] : memref<16x32xbf16, #tpu.memory_space<vmem>>, vector<16x32xbf16>
    %c0_2 = arith.constant 0 : index
    %c0_3 = arith.constant 0 : index
    %6 = vector.load %arg4[%c0_2, %c0_3] : memref<128x32xbf16, #tpu.memory_space<vmem>>, vector<128x32xbf16>
    %cst = arith.constant dense<0.000000e+00> : vector<16x128xf32>
    %7 = tpu.matmul %5, %6, %cst {dimension_numbers = #tpu.dot_dimension_numbers<[1], [1], [0], [0], [0, 0, 1, 0], [], []>} : vector<16x32xbf16>, vector<128x32xbf16>, vector<16x128xf32> -> vector<16x128xf32>
    %c0_4 = arith.constant 0 : index
    %c0_5 = arith.constant 0 : index
    %8 = vector.load %arg2[%c0_4, %c0_5] : memref<16x1xi32, #tpu.memory_space<vmem>>, vector<16x1xi32>
    %c128_i32 = arith.constant 128 : i32
    %9 = arith.muli %arg0, %c128_i32 : i32
    %10 = tpu.iota {dimensions = array<i32: 1>} : vector<16x128xi32>
    %11 = vector.broadcast %9 : i32 to vector<16x128xi32>
    %12 = arith.addi %11, %10 : vector<16x128xi32>
    %13 = vector.broadcast %8 : vector<16x1xi32> to vector<16x128xi32>
    %14 = arith.cmpi eq, %12, %13 : vector<16x128xi32>
    %cst_6 = arith.constant 0.000000e+00 : f32
    %15 = vector.broadcast %cst_6 : f32 to vector<16x128xf32>
    %16 = arith.select %14, %7, %15 : vector<16x128xi1>, vector<16x128xf32>
    %cst_7 = arith.constant dense<0.000000e+00> : vector<16xf32>
    %17 = vector.multi_reduction <add>, %16, %cst_7 [1] : vector<16x128xf32> to vector<16xf32>
    %18 = vector.shape_cast %17 : vector<16xf32> to vector<16x1xf32>
    %19 = arith.mulf %18, %18 : vector<16x1xf32>
    %cst_8 = arith.constant 1.000000e+00 : f32
    %20 = vector.broadcast %cst_8 : f32 to vector<16x1xf32>
    %21 = arith.subf %20, %19 : vector<16x1xf32>
    %cst_9 = arith.constant 0.000000e+00 : f32
    %22 = vector.broadcast %cst_9 : f32 to vector<16x1xf32>
    %23 = arith.maximumf %21, %22 : vector<16x1xf32>
    %24 = math.sqrt %23 : vector<16x1xf32>
    %cst_10 = arith.constant -0.87758255 : f32
    %25 = vector.broadcast %cst_10 : f32 to vector<16x1xf32>
    %26 = arith.cmpf ogt, %18, %25 : vector<16x1xf32>
    %cst_11 = arith.constant 0.87758255 : f32
    %27 = vector.broadcast %cst_11 : f32 to vector<16x1xf32>
    %28 = arith.mulf %18, %27 : vector<16x1xf32>
    %cst_12 = arith.constant 0.47942555 : f32
    %29 = vector.broadcast %cst_12 : f32 to vector<16x1xf32>
    %30 = arith.mulf %24, %29 : vector<16x1xf32>
    %31 = arith.subf %28, %30 : vector<16x1xf32>
    %cst_13 = arith.constant 0.239712775 : f32
    %32 = vector.broadcast %cst_13 : f32 to vector<16x1xf32>
    %33 = arith.subf %18, %32 : vector<16x1xf32>
    %34 = arith.select %26, %31, %33 : vector<16x1xi1>, vector<16x1xf32>
    %35 = arith.subf %34, %18 : vector<16x1xf32>
    %cst_14 = arith.constant 3.000000e+01 : f32
    %36 = vector.broadcast %cst_14 : f32 to vector<16x1xf32>
    %37 = arith.mulf %35, %36 : vector<16x1xf32>
    %cst_15 = arith.constant 3.000000e+01 : f32
    %38 = vector.broadcast %cst_15 : f32 to vector<16x128xf32>
    %39 = arith.mulf %7, %38 : vector<16x128xf32>
    %cst_16 = arith.constant 0.000000e+00 : f32
    %40 = vector.shape_cast %37 : vector<16x1xf32> to vector<16x1xf32>
    %41 = vector.broadcast %40 : vector<16x1xf32> to vector<16x128xf32>
    %42 = vector.broadcast %cst_16 : f32 to vector<16x128xf32>
    %43 = arith.select %14, %41, %42 : vector<16x128xi1>, vector<16x128xf32>
    %44 = arith.addf %39, %43 : vector<16x128xf32>
    %c0_17 = arith.constant 0 : index
    %c0_18 = arith.constant 0 : index
    %45 = vector.load %arg5[%c0_17, %c0_18] : memref<16x128xf32, #tpu.memory_space<vmem>>, vector<16x128xf32>
    tpu.vector_store %arg5[%c0_17, %c0_18], %44 {strides = array<i32>} : memref<16x128xf32, #tpu.memory_space<vmem>>, vector<16x128xf32>,
    %c1_i32 = arith.constant 1 : i32
    %46 = arith.cmpi eq, %arg0, %c1_i32 : i32
    %47 = arith.extui %46 : i1 to i32
    %c0_i32_19 = arith.constant 0 : i32
    %48 = arith.cmpi ne, %47, %c0_i32_19 : i32
    scf.if %48 {
      %c200_i32 = arith.constant 200 : i32
      %70 = vector.broadcast %c200_i32 : i32 to vector<16x128xi32>
      %71 = arith.cmpi slt, %12, %70 : vector<16x128xi32>
      %cst_29 = arith.constant -1.000000e+30 : f32
      %72 = vector.broadcast %cst_29 : f32 to vector<16x128xf32>
      %73 = arith.select %71, %44, %72 : vector<16x128xi1>, vector<16x128xf32>
      %74 = arith.index_cast %1 : i32 to index
      %c0_30 = arith.constant 0 : index
      %75 = vector.load %arg7[%74, %c0_30] : memref<32x1xf32, #tpu.memory_space<vmem>>, vector<16x1xf32>
      %cst_31 = arith.constant dense<0xFF800000> : vector<16xf32>
      %76 = vector.multi_reduction <maximumf>, %73, %cst_31 [1] : vector<16x128xf32> to vector<16xf32>
      %77 = vector.shape_cast %76 : vector<16xf32> to vector<16x1xf32>
      %78 = arith.maximumf %75, %77 : vector<16x1xf32>
      %79 = arith.subf %75, %78 : vector<16x1xf32>
      %80 = math.exp %79 : vector<16x1xf32>
      %81 = vector.broadcast %78 : vector<16x1xf32> to vector<16x128xf32>
      %82 = arith.subf %73, %81 : vector<16x128xf32>
      %83 = math.exp %82 : vector<16x128xf32>
      %84 = arith.index_cast %1 : i32 to index
      %c0_32 = arith.constant 0 : index
      %85 = vector.load %arg8[%84, %c0_32] : memref<32x1xf32, #tpu.memory_space<vmem>>, vector<16x1xf32>
      %86 = arith.mulf %80, %85 : vector<16x1xf32>
      %cst_33 = arith.constant dense<0.000000e+00> : vector<16xf32>
      %87 = vector.multi_reduction <add>, %83, %cst_33 [1] : vector<16x128xf32> to vector<16xf32>
      %88 = vector.shape_cast %87 : vector<16xf32> to vector<16x1xf32>
      %89 = arith.addf %86, %88 : vector<16x1xf32>
      %90 = arith.index_cast %1 : i32 to index
      %c0_34 = arith.constant 0 : index
      %91 = vector.load %arg8[%90, %c0_34] : memref<32x1xf32, #tpu.memory_space<vmem>>, vector<16x1xf32>
      tpu.vector_store %arg8[%90, %c0_34], %89 {strides = array<i32>} : memref<32x1xf32, #tpu.memory_space<vmem>>, vector<16x1xf32>,
      %92 = arith.index_cast %1 : i32 to index
      %c0_35 = arith.constant 0 : index
      %93 = vector.load %arg7[%92, %c0_35] : memref<32x1xf32, #tpu.memory_space<vmem>>, vector<16x1xf32>
      tpu.vector_store %arg7[%92, %c0_35], %78 {strides = array<i32>} : memref<32x1xf32, #tpu.memory_space<vmem>>, vector<16x1xf32>,
    } else {
    }
    %c1_i32_20 = arith.constant 1 : i32
    %49 = arith.cmpi ne, %arg0, %c1_i32_20 : i32
    %50 = arith.extui %49 : i1 to i32
    %c0_i32_21 = arith.constant 0 : i32
    %51 = arith.cmpi ne, %50, %c0_i32_21 : i32
    scf.if %51 {
      %70 = arith.index_cast %1 : i32 to index
      %c0_29 = arith.constant 0 : index
      %71 = vector.load %arg7[%70, %c0_29] : memref<32x1xf32, #tpu.memory_space<vmem>>, vector<16x1xf32>
      %cst_30 = arith.constant dense<0xFF800000> : vector<16xf32>
      %72 = vector.multi_reduction <maximumf>, %44, %cst_30 [1] : vector<16x128xf32> to vector<16xf32>
      %73 = vector.shape_cast %72 : vector<16xf32> to vector<16x1xf32>
      %74 = arith.maximumf %71, %73 : vector<16x1xf32>
      %75 = arith.subf %71, %74 : vector<16x1xf32>
      %76 = math.exp %75 : vector<16x1xf32>
      %77 = vector.broadcast %74 : vector<16x1xf32> to vector<16x128xf32>
      %78 = arith.subf %44, %77 : vector<16x128xf32>
      %79 = math.exp %78 : vector<16x128xf32>
      %80 = arith.index_cast %1 : i32 to index
      %c0_31 = arith.constant 0 : index
      %81 = vector.load %arg8[%80, %c0_31] : memref<32x1xf32, #tpu.memory_space<vmem>>, vector<16x1xf32>
      %82 = arith.mulf %76, %81 : vector<16x1xf32>
      %cst_32 = arith.constant dense<0.000000e+00> : vector<16xf32>
      %83 = vector.multi_reduction <add>, %79, %cst_32 [1] : vector<16x128xf32> to vector<16xf32>
      %84 = vector.shape_cast %83 : vector<16xf32> to vector<16x1xf32>
      %85 = arith.addf %82, %84 : vector<16x1xf32>
      %86 = arith.index_cast %1 : i32 to index
      %c0_33 = arith.constant 0 : index
      %87 = vector.load %arg8[%86, %c0_33] : memref<32x1xf32, #tpu.memory_space<vmem>>, vector<16x1xf32>
      tpu.vector_store %arg8[%86, %c0_33], %85 {strides = array<i32>} : memref<32x1xf32, #tpu.memory_space<vmem>>, vector<16x1xf32>,
      %88 = arith.index_cast %1 : i32 to index
      %c0_34 = arith.constant 0 : index
      %89 = vector.load %arg7[%88, %c0_34] : memref<32x1xf32, #tpu.memory_space<vmem>>, vector<16x1xf32>
      tpu.vector_store %arg7[%88, %c0_34], %74 {strides = array<i32>} : memref<32x1xf32, #tpu.memory_space<vmem>>, vector<16x1xf32>,
    } else {
    }
    %52 = vector.broadcast %9 : i32 to vector<16x1xi32>
    %53 = arith.cmpi sge, %8, %52 : vector<16x1xi32>
    %c128_i32_22 = arith.constant 128 : i32
    %54 = arith.addi %9, %c128_i32_22 : i32
    %55 = vector.broadcast %54 : i32 to vector<16x1xi32>
    %56 = arith.cmpi slt, %8, %55 : vector<16x1xi32>
    %57 = arith.andi %53, %56 : vector<16x1xi1>
    %58 = arith.index_cast %1 : i32 to index
    %c0_23 = arith.constant 0 : index
    %59 = vector.load %arg9[%58, %c0_23] : memref<32x1xf32, #tpu.memory_space<vmem>>, vector<16x1xf32>
    %cst_24 = arith.constant 3.000000e+01 : f32
    %60 = vector.broadcast %cst_24 : f32 to vector<16x1xf32>
    %61 = arith.mulf %34, %60 : vector<16x1xf32>
    %cst_25 = arith.constant 0.000000e+00 : f32
    %62 = vector.broadcast %cst_25 : f32 to vector<16x1xf32>
    %63 = arith.select %57, %61, %62 : vector<16x1xi1>, vector<16x1xf32>
    %64 = arith.addf %59, %63 : vector<16x1xf32>
    %65 = arith.index_cast %1 : i32 to index
    %c0_26 = arith.constant 0 : index
    %66 = vector.load %arg9[%65, %c0_26] : memref<32x1xf32, #tpu.memory_space<vmem>>, vector<16x1xf32>
    tpu.vector_store %arg9[%65, %c0_26], %64 {strides = array<i32>} : memref<32x1xf32, #tpu.memory_space<vmem>>, vector<16x1xf32>,
    %c1_i32_27 = arith.constant 1 : i32
    %67 = arith.cmpi eq, %arg0, %c1_i32_27 : i32
    %68 = arith.extui %67 : i1 to i32
    %c0_i32_28 = arith.constant 0 : i32
    %69 = arith.cmpi ne, %68, %c0_i32_28 : i32
    scf.if %69 {
      %70 = arith.index_cast %1 : i32 to index
      %c0_29 = arith.constant 0 : index
      %71 = vector.load %arg7[%70, %c0_29] : memref<32x1xf32, #tpu.memory_space<vmem>>, vector<16x1xf32>
      %72 = arith.index_cast %1 : i32 to index
      %c0_30 = arith.constant 0 : index
      %73 = vector.load %arg8[%72, %c0_30] : memref<32x1xf32, #tpu.memory_space<vmem>>, vector<16x1xf32>
      %74 = math.log %73 : vector<16x1xf32>
      %75 = arith.addf %71, %74 : vector<16x1xf32>
      %76 = arith.index_cast %1 : i32 to index
      %c0_31 = arith.constant 0 : index
      %77 = vector.load %arg9[%76, %c0_31] : memref<32x1xf32, #tpu.memory_space<vmem>>, vector<16x1xf32>
      %78 = arith.subf %75, %77 : vector<16x1xf32>
      %c0_32 = arith.constant 0 : index
      %c0_33 = arith.constant 0 : index
      %79 = vector.load %arg6[%c0_32, %c0_33] : memref<16x1xf32, #tpu.memory_space<vmem>>, vector<16x1xf32>
      tpu.vector_store %arg6[%c0_32, %c0_33], %78 {strides = array<i32>} : memref<16x1xf32, #tpu.memory_space<vmem>>, vector<16x1xf32>,
    } else {
    }
    return
  }
  func.func @transform_0(%arg0: i32, %arg1: i32) -> (i32, i32) {
    %c0_i32 = arith.constant 0 : i32
    %c0_i32_0 = arith.constant 0 : i32
    return %arg1, %c0_i32 : i32, i32
  }
  func.func @transform_1(%arg0: i32, %arg1: i32) -> (i32, i32) {
    %c0_i32 = arith.constant 0 : i32
    %c0_i32_0 = arith.constant 0 : i32
    return %arg1, %c0_i32 : i32, i32
  }
  func.func @transform_2(%arg0: i32, %arg1: i32) -> (i32, i32) {
    %c0_i32 = arith.constant 0 : i32
    %c0_i32_0 = arith.constant 0 : i32
    return %arg0, %c0_i32 : i32, i32
  }
  func.func @transform_3(%arg0: i32, %arg1: i32) -> (i32, i32) {
    %c0_i32 = arith.constant 0 : i32
    return %arg1, %arg0 : i32, i32
  }
  func.func @transform_4(%arg0: i32, %arg1: i32) -> (i32, i32) {
    %c0_i32 = arith.constant 0 : i32
    %c0_i32_0 = arith.constant 0 : i32
    return %arg1, %c0_i32 : i32, i32
  }
}

</mosaic_0001>

<bundles_post_ra>
// kernel: tpu_custom_call.1
= control target key start
LH: loop header
LB: loop body
LE: loop exit
PB: predicated region body
PF: predicated region fallthrough
CT: control target
= control target key end

     0   :  { %10 = vsyncpa [#allocation6], 0  ;;  %s1348_s0 = inlined_call_operand.vmem [shape: s32[32,1], index: 0, kind: input, shape index: {}]   ;;  %s1349_s1 = inlined_call_operand.vmem [shape: bf16[32,32], index: 1, kind: input, shape index: {}]   ;;  %s1350_s2 = inlined_call_operand.vmem [shape: bf16[256,32], index: 2, kind: input, shape index: {}]   ;;  %s1351_s3 = inlined_call_operand.hbm [shape: f32[32,256], index: 3, kind: output, shape index: {0}]   ;;  %s1352_s4 = inlined_call_operand.vmem [shape: f32[32,1], index: 4, kind: output, shape index: {1}]  }
   0x1   :  { %12 = vsyncpa [#allocation6 + $0x1], 0  ;;  %s1095_s15 = smov 0   ;;  %s1097_s16 = smov 0  }
   0x2   :  { %s1099_s17 = smov 0   ;;  %s1101_s18 = smov 0  }
   0x3   :  { %s1103_s19 = smov 0   ;;  %s1105_s20 = smov 0  }
   0x4   :  { %s1107_s21 = smov 0   ;;  %s1109_s22 = smov 0  }
   0x5 LB: > { %1358 = sst [smem:[#allocation8_spill]] %s1052_s20  ;;  %s783_s23 = sadd.s32 4294967295, %s1060_s22   ;;  %s1060_s22 = sphi %s1109_s22, %s18_s22   ;;  %s1056_s21 = sphi %s1107_s21, %s1370_s21   ;;  %s1052_s20 = sphi %s1105_s20, %s1369_s20   ;;  %s1048_s19 = sphi %s1103_s19, %s1368_s19   ;;  %s1044_s18 = sphi %s1101_s18, %s1367_s18   ;;  %s1040_s17 = sphi %s1099_s17, %s1373_s17   ;;  %s1036_s16 = sphi %s1097_s16, %s1372_s16   ;;  %s1032_s15 = sphi %s1095_s15, %s1371_s15  }
   0x6   : > { %1359 = sst [smem:[#allocation9_spill]] %s1056_s21  ;;  %s784_s24 = sadd.s32 4294967294, %s1060_s22  }
   0x7   : > { %s27_s25 = sadd.s32 1, %s1052_s20  ;;  %s30_s26 = sadd.s32 1, %s1056_s21 }
   0x8   : > { %p28_p0 = scmp.ge.s32.totalorder %s27_s25, 2  ;;  %p127_p1 = scmp.ne.s32.totalorder %s1040_s17, %s1036_s16 }
   0x9   : > { %p128_p2 = scmp.eq.s32.totalorder %s783_s23, 3  ;;  %p133_p5 = scmp.ne.s32.totalorder %s1036_s16, %s1032_s15 }
   0xa   : > { %s1375_s25 = smov (%p28_p0, %s27_s25), 0  ;;  %s1377_s26 = smov (!%p28_p0, %s30_s26), %s1056_s21 }
   0xb   : > { %1360 = sst [smem:[#allocation10_spill]] %s1375_s25  ;;  %s112_s27 = ssub.s32 %s1052_s20, %s1375_s25 }
   0xc   : > { %p1146_p3 = por %p128_p2, %p127_p1  ;;  %p32_p4 = scmp.ge.s32.totalorder %s1377_s26, 2 }
   0xd   : > { %p134_p6 = scmp.eq.s32.totalorder %s784_s24, 3  ;;  %p787_p7 = scmp.ge.s32.totalorder %s1060_s22, 1 }
   0xe   : > { %s1379_s26 = smov (%p32_p4, %s1377_s26), 0  ;;  %p205_p9 = scmp.lt.s32.totalorder %s1060_s22, 5 }
   0xf   : > { %1362 = sst [smem:[#allocation11_spill]] %s1379_s26  ;;  %p1155_p8 = por %p134_p6, %p133_p5 }
  0x10   : > { %s113_s30 = ssub.s32 %s1056_s21, %s1379_s26  ;;  %s117_s5 = sadd.s32 1, %s1040_s17 }
  0x11   : > { %s114_s6 = sor.u32 %s113_s30, %s112_s27  ;;  %p206_p10 = pnand %p787_p7, %p205_p9 }
  0x12   : > { %p115_p11 = scmp.eq.s32.totalorder %s114_s6, 0  ;;  %s1353_s8 = sand.u32 (!%p206_p10), 1, %s1036_s16  }
  0x13   : > { %209 = sbr.rel (%p206_p10) target bundleno = 1193 (0x4a9), region = 32  ;;  %s789_s9 = sshll.u32 (!%p206_p10), %s1044_s18, 1 }
  0x14   : > { %s1164_s7 = scalar_select %p115_p11, %s1040_s17, %s117_s5  }
  0x15   : > { %s788_s10 = sshll.u32 (!%p206_p10), %s1353_s8, 4  ;;  %p247_p12 = scmp.lt.s32.totalorder (!%p206_p10), %s789_s9, 3 }
  0x16   : > { %1364 = sst [smem:[#allocation12_spill]] %s1164_s7  ;;  %s793_s11 = sshll.u32 (!%p206_p10), %s1048_s19, 4 }
  0x17   : > { %p259_p13 = scmp.lt.s32.totalorder (!%p206_p10), %s793_s11, 31  ;;  %s1172_s12 = sshll.u32 (!%p206_p10), %s1044_s18, 4 }
  0x18   : > { %s1381_s9 = smov (!%p247_p12, %s789_s9), 3  ;;  %s1194_s23 = scalar_lea.vmem [#allocation5], %s788_s10 }
  0x19   : > { %s790_s13 = sshll.u32 %s1381_s9, 3  ;;  %s792_s14 = sshll.u32 %s1381_s9, 2 }
  0x1a   : > { %s1177_s27 = scalar_lea.vmem %s1348_s0, %s790_s13  ;;  %s1182_s6 = scalar_lea.vmem %s1349_s1, %s792_s14 }
  0x1b   : > { %s1383_s11 = smov (!%p259_p13, %s793_s11), 31  ;;  %s1187_s25 = scalar_lea.vmem %s1352_s4, %s790_s13 }
  0x1c   : > { %s794_s21 = sshll.u32 %s1383_s11, 2  ;;  %p798_p0 = scmp.ne.s32.totalorder %s1048_s19, 0 }
  0x1d   : > { %s1192_s9 = scalar_lea.vmem %s1350_s2, %s794_s21  ;;  %s276_s14 = scalar_lea.vmem (!%p798_p0), [#allocation2], %s1172_s12 }
  0x1e   : > { %275 = sbr.rel (%p798_p0) target bundleno = 42 (0x2a), region = 36  ;;  %s280_s26 = scalar_lea.vmem (!%p798_p0), [#allocation3], %s1172_s12 }
  0x1f   : > { %s283_s20 = scalar_lea.vmem (!%p798_p0), [#allocation4], %s1172_s12 }
  0x23   : > { %vm277_vm0 = vcmask 7168   ;;  %v1062_v0 = vmov -1e+30   ;;  %v1063_v1 = vmov 0.0  }
  0x24   : > { %278 = vst.msk [vmem:[%s276_s14] sm:$0xff] %vm277_vm0, %v1062_v0 }
  0x25   : > { %279 = vst.msk [vmem:[%s276_s14 + $0x8] sm:$0xff] %vm277_vm0, %v1062_v0 }
  0x26   : > { %281 = vst.msk [vmem:[%s280_s26] sm:$0xff] %vm277_vm0, %v1063_v1 }
  0x27   : > { %282 = vst.msk [vmem:[%s280_s26 + $0x8] sm:$0xff] %vm277_vm0, %v1063_v1 }
  0x28   : > { %284 = vst.msk [vmem:[%s283_s20] sm:$0xff] %vm277_vm0, %v1063_v1 }
  0x29   : > { %285 = vst.msk [vmem:[%s283_s20 + $0x8] sm:$0xff] %vm277_vm0, %v1063_v1 }
  0x2a PF: > { %v856_v2 = vld [vmem:[%s1192_s9 + $0x38] sm:$0xff]  ;;  %vm349_vm1 = vcmask 261120   ;;  %v855_v4 = vld [vmem:[%s1192_s9 + $0x30] sm:$0xff]  ;;  %v854_v6 = vld [vmem:[%s1192_s9 + $0x28] sm:$0xff]  ;;  %v1064_v13 = vmov 0   ;;  %v394_v22 = vlaneseq  ;;  %s836_s21 = sshll.u32 %s1048_s19, 7 }
  0x2b   : > { %v375_v3 = vsel %vm349_vm1, %v856_v2, 0  ;;  %v372_v5 = vsel %vm349_vm1, %v855_v4, 0  ;;  %v369_v7 = vsel %vm349_vm1, %v854_v6, 0  ;;  %v853_v8 = vld [vmem:[%s1192_s9 + $0x20] sm:$0xff]  ;;  %v852_v10 = vld [vmem:[%s1192_s9 + $0x18] sm:$0xff]  ;;  %937 = vset.pattern.permute.xlu0 %v1064_v13  ;;  %v851_v14 = vld [vmem:[%s1192_s9 + $0x10] sm:$0xff]  ;;  %v1229_v24 = vstv %s836_s21 }
  0x2c   : > { %377 = vmatpush.bf16.xpose.msra.mxu0 %v375_v3  ;;  %v366_v9 = vsel %vm349_vm1, %v853_v8, 0  ;;  %v363_v11 = vsel %vm349_vm1, %v852_v10, 0  ;;  %v1211_v12 = vld [vmem:[%s1177_s27] sm:$0xff]  ;;  %v360_v15 = vsel %vm349_vm1, %v851_v14, 0  ;;  %v1217_v16 = vld [vmem:[%s1177_s27 + $0x8] sm:$0xff]  ;;  %v395_v23 = vand.u32 127, %v394_v22 }
  0x2d   : > { %399 = vperm.xlu0 %937, %v1211_v12   ;;  %v850_v17 = vld [vmem:[%s1192_s9 + $0x8] sm:$0xff]  ;;  %v849_v19 = vld [vmem:[%s1192_s9] sm:$0xff]  ;;  %p839_p1 = scmp.ne.s32.totalorder %s1048_s19, 1 }
  0x2e   : > { %v357_v18 = vsel %vm349_vm1, %v850_v17, 0  ;;  %v354_v20 = vsel %vm349_vm1, %v849_v19, 0  ;;  %v848_v21 = vld [vmem:[%s1182_s6] sm:$0xff]  ;;  %v1232_v25 = vadd.s32 %v1229_v24, %v395_v23  ;;  %s473_s7 = scalar_lea.vmem (!%p839_p1), [#allocation2], %s1172_s12  ;;  %s504_s8 = scalar_lea.vmem (!%p839_p1), [#allocation3], %s1172_s12 }
  0x34   : > { %378 = vmatpush.bf16.xpose.msra.mxu0 %v372_v5 }
  0x35   : > { %402 = vperm.xlu0 %937, %v1217_v16  }
  0x3c   : > { %379 = vmatpush.bf16.xpose.msra.mxu0 %v369_v7 }
  0x44   : > { %380 = vmatpush.bf16.xpose.msra.mxu0 %v366_v9 }
  0x4c   : > { %381 = vmatpush.bf16.xpose.msra.mxu0 %v363_v11 }
  0x54   : > { %382 = vmatpush.bf16.xpose.msra.mxu0 %v360_v15 }
  0x5c   : > { %383 = vmatpush.bf16.xpose.msra.mxu0 %v357_v18 }
  0x64   : > { %384 = vmatpush.bf16.xpose.msra.mxu0 %v354_v20 }
  0x6b   : > { %835 = vmatmul.msk.bf16.vlgmr.msra.gmra.mxu0 %vm349_vm1, %v848_v21 }
  0x9f   : > { %v400_v26 = vpop.permute.xlu0 %399 }
  0xa0   : > { %vm404_vm2 = vcmp.eq.s32.totalorder %v1232_v25, %v400_v26 }
  0xa7   : > { %v403_v29 = vpop.permute.xlu0 %402 }
  0xa8   : > { %vm405_vm3 = vcmp.eq.s32.totalorder %v1232_v25, %v403_v29 }
  0xe8   : > { %v386_v27 = vpop.f32.mrf.mxu0 }
  0xe9   : > { %v406_v28 = vsel %vm404_vm2, %v386_v27, 0.0  ;;  %v458_v3 = vmul.f32 30.0, %v386_v27 }
  0xea   : > { %408 = vadd.xlane.f32.xlu1 %v406_v28 }
  0xf0   : > { %v388_v30 = vpop.f32.mrf.mxu0 }
  0xf1   : > { %v407_v31 = vsel %vm405_vm3, %v388_v30, 0.0  ;;  %v459_v14 = vmul.f32 30.0, %v388_v30 }
  0xf2   : > { %410 = vadd.xlane.f32.xlu1 %v407_v31 }
 0x15d   : > { %v409_v32 = vpop.xlane.xlu1 %408 }
 0x15e   : > { %v412_v33 = vmul.f32 %v409_v32, %v409_v32  ;;  %v444_v54 = vmul.f32 0.87758255, %v409_v32  ;;  %v837_v58 = vadd.f32 -0.23971277, %v409_v32  ;;  %vm442_vm6 = vcmp.gt.f32.partialorder %v409_v32, -0.87758255 }
 0x160   : > { %v414_v34 = vsub.f32 1.0, %v412_v33 }
 0x162   : > { %v416_v35 = vmax.f32 %v414_v34, 0.0 }
 0x164   : > { %938 = vrsqrt.f32 %v416_v35  ;;  %vm425_vm4 = vcmp.eq.f32.partialorder %v416_v35, inf  ;;  %v428_v50 = vand.u32 2147483648, %v416_v35  ;;  %vm427_vm5 = vcmp.eq.f32.partialorder %v416_v35, 0.0 }
 0x165   : > { %v411_v36 = vpop.xlane.xlu1 %410 }
 0x166   : > { %v413_v37 = vmul.f32 %v411_v36, %v411_v36  ;;  %v445_v4 = vmul.f32 0.87758255, %v411_v36  ;;  %v838_v9 = vadd.f32 -0.23971277, %v411_v36  ;;  %vm443_vm9 = vcmp.gt.f32.partialorder %v411_v36, -0.87758255 }
 0x168   : > { %v415_v38 = vsub.f32 1.0, %v413_v37 }
 0x16a   : > { %v939_v39 = vpop.eup %938  ;;  %v417_v40 = vmax.f32 %v415_v38, 0.0 }
 0x16b   : > { %v419_v41 = vmul.f32 %v939_v39, %v416_v35 }
 0x16c   : > { %940 = vrsqrt.f32 %v417_v40  ;;  %vm437_vm7 = vcmp.eq.f32.partialorder %v417_v40, inf  ;;  %v440_v63 = vand.u32 2147483648, %v417_v40  ;;  %vm439_vm8 = vcmp.eq.f32.partialorder %v417_v40, 0.0 }
 0x16d   : > { %v420_v42 = vmul.f32 %v939_v39, %v419_v41 }
 0x16f   : > { %v421_v43 = vmul.f32 0.5, %v420_v42 }
 0x171   : > { %v422_v44 = vsub.f32 1.5, %v421_v43 }
 0x172   : > { %v941_v45 = vpop.eup %940 }
 0x173   : > { %v423_v46 = vmul.f32 %v939_v39, %v422_v44  ;;  %v431_v47 = vmul.f32 %v941_v45, %v417_v40 }
 0x175   : > { %v424_v48 = vmul.f32 %v423_v46, %v416_v35  ;;  %v432_v49 = vmul.f32 %v941_v45, %v431_v47 }
 0x177   : > { %v426_v51 = vsel %vm425_vm4, %v416_v35, %v424_v48  ;;  %v433_v52 = vmul.f32 0.5, %v432_v49 }
 0x178   : > { %v429_v53 = vsel %vm427_vm5, %v428_v50, %v426_v51 }
 0x179   : > { %v446_v55 = vmul.f32 0.47942555, %v429_v53  ;;  %v434_v56 = vsub.f32 1.5, %v433_v52 }
 0x17b   : > { %v448_v57 = vsub.f32 %v444_v54, %v446_v55  ;;  %v435_v59 = vmul.f32 %v941_v45, %v434_v56 }
 0x17d   : > { %v1240_v60 = vsel %vm442_vm6, %v448_v57, %v837_v58  ;;  %v436_v61 = vmul.f32 %v435_v59, %v417_v40 }
 0x17e   : > { %v454_v62 = vsub.f32 %v1240_v60, %v409_v32 }
 0x17f   : > { %v438_v0 = vsel %vm437_vm7, %v417_v40, %v436_v61 }
 0x180   : > { %v456_v1 = vmul.f32 30.0, %v454_v62  ;;  %v441_v2 = vsel %vm439_vm8, %v440_v63, %v438_v0 }
 0x181   : > { %v447_v5 = vmul.f32 0.47942555, %v441_v2 }
 0x182   : > { %v460_v6 = vsel %vm404_vm2, %v456_v1, 0.0 }
 0x183   : > { %v1245_v7 = vadd.f32 %v460_v6, %v458_v3  ;;  %v449_v8 = vsub.f32 %v445_v4, %v447_v5 }
 0x185   : > { %464 = vst [vmem:[%s1194_s23] sm:$0xff] %v1245_v7  ;;  %v1249_v10 = vsel %vm443_vm9, %v449_v8, %v838_v9 }
 0x186   : > { %v455_v11 = vsub.f32 %v1249_v10, %v411_v36 }
 0x188   : > { %v457_v13 = vmul.f32 30.0, %v455_v11 }
 0x189   : > { %469 = sbr.rel (%p839_p1) target bundleno = 771 (0x303), region = 40 }
 0x18a   : > { %v461_v15 = vsel %vm405_vm3, %v457_v13, 0.0 }
 0x18b   : > { %v1254_v17 = vadd.f32 %v461_v15, %v459_v14 }
 0x18d   : > { %465 = vst [vmem:[%s1194_s23 + $0x8] sm:$0xff] %v1254_v17 }
 0x18e   : > { %vm470_vm10 = vcmp.lt.s32.totalorder %v1232_v25, 200  ;;  %v1065_v20 = vmov 0   ;;  %v474_v21 = vld [vmem:[%s473_s7] sm:$0xff]  ;;  %vm515_vm11 = vcmask 7168   ;;  %v475_v27 = vld [vmem:[%s473_s7 + $0x8] sm:$0xff] }
 0x18f   : > { %v471_v18 = vsel %vm470_vm10, %v1245_v7, -1e+30  ;;  %v472_v19 = vsel %vm470_vm10, %v1254_v17, -1e+30  ;;  %942 = vset.pattern.permute.xlu1 %v1065_v20  ;;  %943 = vset.pattern.permute.xlu0 %v1065_v20  ;;  %v505_v41 = vld [vmem:[%s504_s8] sm:$0xff]  ;;  %v506_v46 = vld [vmem:[%s504_s8 + $0x8] sm:$0xff] }
 0x190   : > { %476 = vmax.xlane.f32.xlu0 %v471_v18 }
 0x198   : > { %478 = vmax.xlane.f32.xlu0 %v472_v19 }
 0x203   : > { %v477_v22 = vpop.xlane.xlu0 %476 }
 0x204   : > { %v480_v23 = vmax.f32 %v474_v21, %v477_v22 }
 0x206   : > { %v482_v26 = vsub.f32 %v474_v21, %v480_v23  ;;  %518 = vst.msk [vmem:[%s473_s7] sm:$0xff] %vm515_vm11, %v480_v23  ;;  %490 = vperm.xlu1 %942, %v480_v23  }
 0x208   : > { %v484_v38 = vmul.f32 1.442695, %v482_v26 }
 0x20b   : > { %v479_v25 = vpop.xlane.xlu0 %478 }
 0x20c   : > { %v481_v28 = vmax.f32 %v475_v27, %v479_v25 }
 0x20e   : > { %v483_v29 = vsub.f32 %v475_v27, %v481_v28  ;;  %519 = vst.msk [vmem:[%s473_s7 + $0x8] sm:$0xff] %vm515_vm11, %v481_v28  ;;  %495 = vperm.xlu1 %942, %v481_v28  }
 0x210   : > { %v486_v39 = vmul.f32 1.442695, %v483_v29 }
 0x278   : > { %v491_v30 = vpop.permute.xlu1 %490 }
 0x279   : > { %v498_v31 = vsub.f32 %v471_v18, %v491_v30 }
 0x27b   : > { %v500_v32 = vmul.f32 1.442695, %v498_v31 }
 0x27d   : > { %944 = vpow2.f32 %v500_v32 }
 0x280   : > { %v496_v33 = vpop.permute.xlu1 %495 }
 0x281   : > { %v499_v34 = vsub.f32 %v472_v19, %v496_v33 }
 0x283   : > { %v945_v35 = vpop.eup %944  ;;  %v502_v36 = vmul.f32 1.442695, %v499_v34 }
 0x284   : > { %509 = vadd.xlane.f32.xlu2 %v945_v35 }
 0x285   : > { %946 = vpow2.f32 %v502_v36 }
 0x286   : > { %948 = vpow2.f32 %v484_v38 }
 0x287   : > { %950 = vpow2.f32 %v486_v39 }
 0x28b   : > { %v947_v37 = vpop.eup %946 }
 0x28c   : > { %511 = vadd.xlane.f32.xlu2 %v947_v37  ;;  %v949_v40 = vpop.eup %948 }
 0x28d   : > { %v507_v42 = vmul.f32 %v949_v40, %v505_v41  ;;  %v951_v45 = vpop.eup %950 }
 0x28e   : > { %v508_v47 = vmul.f32 %v951_v45, %v506_v46 }
 0x2f7   : > { %v510_v43 = vpop.xlane.xlu2 %509 }
 0x2f8   : > { %v513_v44 = vadd.f32 %v510_v43, %v507_v42 }
 0x2fa   : > { %516 = vst.msk [vmem:[%s504_s8] sm:$0xff] %vm515_vm11, %v513_v44 }
 0x2ff   : > { %v512_v48 = vpop.xlane.xlu2 %511 }
 0x300   : > { %v514_v49 = vadd.f32 %v512_v48, %v508_v47 }
 0x302   : > { %517 = vst.msk [vmem:[%s504_s8 + $0x8] sm:$0xff] %vm515_vm11, %v514_v49 }
 0x303 PF: > { %p840_p2 = scmp.eq.s32.totalorder %s1048_s19, 1 }
 0x304   : > { %s524_s10 = scalar_lea.vmem (!%p840_p2), [#allocation2], %s1172_s12  ;;  %s555_s11 = scalar_lea.vmem (!%p840_p2), [#allocation3], %s1172_s12 }
 0x305   : > { %523 = sbr.rel (%p840_p2) target bundleno = 1149 (0x47d), region = 44 }
 0x30a   : > { %527 = vmax.xlane.f32.xlu0 %v1245_v7  ;;  %v1066_v50 = vmov 0   ;;  %v525_v51 = vld [vmem:[%s524_s10] sm:$0xff]  ;;  %vm566_vm12 = vcmask 7168   ;;  %v526_v55 = vld [vmem:[%s524_s10 + $0x8] sm:$0xff] }
 0x30b   : > { %952 = vset.pattern.permute.xlu1 %v1066_v50  ;;  %953 = vset.pattern.permute.xlu0 %v1066_v50  ;;  %v556_v8 = vld [vmem:[%s555_s11] sm:$0xff]  ;;  %v557_v14 = vld [vmem:[%s555_s11 + $0x8] sm:$0xff] }
 0x312   : > { %529 = vmax.xlane.f32.xlu0 %v1254_v17 }
 0x37d   : > { %v528_v52 = vpop.xlane.xlu0 %527 }
 0x37e   : > { %v531_v53 = vmax.f32 %v525_v51, %v528_v52 }
 0x380   : > { %v533_v54 = vsub.f32 %v525_v51, %v531_v53  ;;  %569 = vst.msk [vmem:[%s524_s10] sm:$0xff] %vm566_vm12, %v531_v53  ;;  %541 = vperm.xlu1 %952, %v531_v53  }
 0x382   : > { %v535_v4 = vmul.f32 1.442695, %v533_v54 }
 0x385   : > { %v530_v56 = vpop.xlane.xlu0 %529 }
 0x386   : > { %v532_v57 = vmax.f32 %v526_v55, %v530_v56 }
 0x388   : > { %v534_v58 = vsub.f32 %v526_v55, %v532_v57  ;;  %570 = vst.msk [vmem:[%s524_s10 + $0x8] sm:$0xff] %vm566_vm12, %v532_v57  ;;  %546 = vperm.xlu1 %952, %v532_v57  }
 0x38a   : > { %v537_v5 = vmul.f32 1.442695, %v534_v58 }
 0x3f2   : > { %v542_v59 = vpop.permute.xlu1 %541 }
 0x3f3   : > { %v549_v61 = vsub.f32 %v1245_v7, %v542_v59 }
 0x3f5   : > { %v551_v62 = vmul.f32 1.442695, %v549_v61 }
 0x3f7   : > { %954 = vpow2.f32 %v551_v62 }
 0x3fa   : > { %v547_v63 = vpop.permute.xlu1 %546 }
 0x3fb   : > { %v550_v0 = vsub.f32 %v1254_v17, %v547_v63 }
 0x3fd   : > { %v955_v1 = vpop.eup %954  ;;  %v553_v2 = vmul.f32 1.442695, %v550_v0 }
 0x3fe   : > { %560 = vadd.xlane.f32.xlu2 %v955_v1 }
 0x3ff   : > { %956 = vpow2.f32 %v553_v2 }
 0x400   : > { %958 = vpow2.f32 %v535_v4 }
 0x401   : > { %960 = vpow2.f32 %v537_v5 }
 0x405   : > { %v957_v3 = vpop.eup %956 }
 0x406   : > { %562 = vadd.xlane.f32.xlu2 %v957_v3  ;;  %v959_v6 = vpop.eup %958 }
 0x407   : > { %v558_v9 = vmul.f32 %v959_v6, %v556_v8  ;;  %v961_v13 = vpop.eup %960 }
 0x408   : > { %v559_v15 = vmul.f32 %v961_v13, %v557_v14 }
 0x471   : > { %v561_v7 = vpop.xlane.xlu2 %560 }
 0x472   : > { %v564_v11 = vadd.f32 %v561_v7, %v558_v9 }
 0x474   : > { %567 = vst.msk [vmem:[%s555_s11] sm:$0xff] %vm566_vm12, %v564_v11 }
 0x479   : > { %v563_v17 = vpop.xlane.xlu2 %562 }
 0x47a   : > { %v565_v18 = vadd.f32 %v563_v17, %v559_v15 }
 0x47c   : > { %568 = vst.msk [vmem:[%s555_s11 + $0x8] sm:$0xff] %vm566_vm12, %v565_v18 }
 0x47d PF: > { %vm571_vm13 = vcmp.ge.s32.totalorder %v1211_v12, %v1229_v24  ;;  %s573_s13 = sadd.s32 128, %s836_s21  ;;  %v582_v19 = vmul.f32 30.0, %v1240_v60  ;;  %vm572_vm14 = vcmp.ge.s32.totalorder %v1217_v16, %v1229_v24  ;;  %v583_v21 = vmul.f32 30.0, %v1249_v10  ;;  %s579_s24 = scalar_lea.vmem [#allocation4], %s1172_s12 }
 0x47e   : > { %v574_v20 = vstv %s573_s13  ;;  %v580_v22 = vld [vmem:[%s579_s24] sm:$0xff]  ;;  %v581_v23 = vld [vmem:[%s579_s24 + $0x8] sm:$0xff]  ;;  %vm588_vm2 = vcmask 7168   ;;  %s597_s27 = scalar_lea.vmem (!%p839_p1), [#allocation3], %s1172_s12  ;;  %s594_s30 = scalar_lea.vmem (!%p839_p1), [#allocation2], %s1172_s12 }
 0x47f   : > { %vm575_vm15 = vcmp.lt.s32.totalorder %v1211_v12, %v574_v20  ;;  %vm576_vm0 = vcmp.lt.s32.totalorder %v1217_v16, %v574_v20 }
 0x480   : > { %vm577_vm1 = vmand %vm571_vm13, %vm575_vm15 }
 0x481   : > { %v584_v26 = vsel %vm577_vm1, %v582_v19, 0.0  ;;  %vm578_vm3 = vmand %vm572_vm14, %vm576_vm0  ;;  %593 = sbr.rel (%p839_p1) target bundleno = 1174 (0x496), region = 48 }
 0x482   : > { %v586_v27 = vadd.f32 %v584_v26, %v580_v22  ;;  %v585_v25 = vsel %vm578_vm3, %v583_v21, 0.0 }
 0x483   : > { %v587_v60 = vadd.f32 %v585_v25, %v581_v23 }
 0x484   : > { %589 = vst.msk [vmem:[%s579_s24] sm:$0xff] %vm588_vm2, %v586_v27 }
 0x485   : > { %590 = vst.msk [vmem:[%s579_s24 + $0x8] sm:$0xff] %vm588_vm2, %v587_v60 }
 0x486   : > { %v598_v12 = vld [vmem:[%s597_s27] sm:$0xff]  ;;  %v599_v16 = vld [vmem:[%s597_s27 + $0x8] sm:$0xff] }
 0x487   : > { %962 = vlog2.f32 %v598_v12  ;;  %v595_v10 = vld [vmem:[%s594_s30] sm:$0xff]  ;;  %v596_v30 = vld [vmem:[%s594_s30 + $0x8] sm:$0xff] }
 0x488   : > { %964 = vlog2.f32 %v599_v16 }
 0x48b   : > { %v606_v31 = vld [vmem:[%s579_s24] sm:$0xff] }
 0x48c   : > { %v607_v34 = vld [vmem:[%s579_s24 + $0x8] sm:$0xff] }
 0x48d   : > { %v963_v24 = vpop.eup %962 }
 0x48e   : > { %v965_v28 = vpop.eup %964  ;;  %v601_v29 = vmul.f32 0.6931472, %v963_v24 }
 0x48f   : > { %v603_v32 = vmul.f32 0.6931472, %v965_v28 }
 0x490   : > { %v604_v33 = vadd.f32 %v601_v29, %v595_v10 }
 0x491   : > { %v605_v35 = vadd.f32 %v603_v32, %v596_v30 }
 0x492   : > { %v608_v36 = vsub.f32 %v604_v33, %v606_v31 }
 0x493   : > { %v609_v37 = vsub.f32 %v605_v35, %v607_v34 }
 0x494   : > { %610 = vst.msk [vmem:[%s1187_s25] sm:$0xff] %vm588_vm2, %v608_v36 }
 0x495   : > { %611 = vst.msk [vmem:[%s1187_s25 + $0x8] sm:$0xff] %vm588_vm2, %v609_v37 }
 0x496 PF: > { %s857_s12 = sshll.u32 %s1044_s18, 2  ;;  %s632_s6 = sshll.u32 %s1194_s23, 4  ;;  %s633_s6 = int_to_ptr.vmem [resolvable:$true] %s632_s6 }
 0x497   : > { %s629_s5 = sadd.s32 %s1048_s19, %s857_s12  ;;  %s1365_s7 = sand.u32 1, %s1036_s16  }
 0x498   : > { %s845_s9 = sshll.u32 %s629_s5, 3  ;;  %s613_s8 = scalar_lea.sflag [#allocation6], %s1365_s7 }
 0x499   : > { %s631_s20 = scalar_lea.hbm %s1351_s3, %s845_s9  ;;  %s986_s23 = scalar_lea.hbm %s1351_s3, 64 }
 0x49a   : > { %s634_s21 = sshll.u32 %s631_s20, 4  ;;  %s635_s21 = int_to_ptr.hbm [resolvable:$true] %s634_s21 }
 0x49b   : > { %s980_s25 = sshra.s32 %s635_s21, 4  ;;  %s981_s25 = int_to_ptr.hbm [resolvable:$true] %s980_s25 }
 0x49c   : > { %s982_s10 = scalar_lea.hbm %s981_s25, 16  ;;  %p987_p7 = scmp.lt.s32.totalorder %s981_s25, %s1351_s3 }
 0x49d   : > { %p983_p4 = scmp.ne.s32.totalorder %s981_s25, %s982_s10  ;;  %p988_p9 = scmp.lt.s32.totalorder %s986_s23, %s982_s10 }
 0x49f   : > { %p984_p5 = pnand %p983_p4, %p1146_p3  ;;  %p989_p10 = por %p988_p9, %p987_p7 }
 0x4a1   : > { %p985_p6 = pneg %p984_p5 }
 0x4a3   : > { %p990_p11 = pnand %p989_p10, %p985_p6 }
 0x4a5   : > { %993 = shalt.err (!%p990_p11)
}
 0x4a6   : > { %s1067_s24 = smov 128   ;;  %s1068_s27 = smov 256  }
 0x4a7   : > { %s1069_s30 = smov 8  }
 0x4a8   : > { %858 = dma.vmem_to_hbm [thread:$0]  (%p1146_p3), %s633_s6, 256, %s635_s21, %s613_s8, %s1067_s24, %s1068_s27, %s1069_s30  }
 0x4a9 PF: > { %p864_p12 = scmp.ge.s32.totalorder %s1060_s22, 2  ;;  %s653_s12 = sand.u32 1, %s1032_s15  }
 0x4aa   : > { %s654_s5 = scalar_lea.sflag [#allocation6], %s653_s12 }
 0x4ab   : > { %p861_p13 = pnand %p864_p12, %p1155_p8 }
 0x4ad   : > { %p862_p0 = pneg %p861_p13 }
 0x4af   : > { %1027 = dma.done.wait (%p862_p0), %s654_s5, 256  }
 0x4b0   : > { %1029 = vsyncadd (%p862_p0), %s654_s5, 4294967040  ;;  %s18_s22 = sadd.s32 1, %s1060_s22   ;;  %s1366_s9 = sld [smem:[#allocation12_spill]] }
 0x4b1   : > { %p15_p1 = scmp.ge.s32.totalorder %s18_s22, 6   ;;  %s1367_s18 = sld [smem:[#allocation8_spill]] }
 0x4b2   : > { %s1368_s19 = sld [smem:[#allocation9_spill]]  ;;  %s1371_s15 = smov %s1036_s16 }
 0x4b3   : > { %s1369_s20 = sld [smem:[#allocation10_spill]]  ;;  %s1372_s16 = smov %s1040_s17 }
 0x4b4   : > { %s1370_s21 = sld [smem:[#allocation11_spill]]  ;;  %17 = sbr.rel (!%p15_p1) target bundleno = 5 (0x5), region = 111 }
 0x4b6   : > { %s1373_s17 = smov %s1366_s9 }
 0x4b9   :  { %668 = vsyncpa [#allocation6], 1 }
 0x4ba   :  { %670 = vsyncpa [#allocation6 + $0x1], 1 }

</bundles_post_ra>
